<compile_context>
chip_gen: v7x
topology: tpu7x:2x2x1
jax: 0.10.0
libtpu: 0.0.40
codegen_flags: <defaults>
</compile_context>

<pallas_src>
import functools

import jax
import jax.numpy as jnp
from jax.experimental import pallas as pl
from jax.experimental.pallas import tpu as pltpu

_LANES = 128


def _bexpu_math(x, f0: float, xmax: float):
    # min(x, xmax) == x - relu(x - xmax); clamp BEFORE exp2 (keeps ragged-block
    # garbage reads finite).
    xs = jnp.minimum(x.astype(jnp.float32), xmax)
    return f0 * (jnp.exp2(xs) - 1.0)


def _bexpu_kernel(x_ref, o_ref, *, f0: float, xmax: float):
    o_ref[...] = _bexpu_math(x_ref[...], f0, xmax).astype(o_ref.dtype)


def bexpu_jnp(x: jnp.ndarray, *, base_freq: float, noctaves: int) -> jnp.ndarray:
    """Plain-jnp path: use when the caller wants XLA to fuse BExpU into
    adjacent elementwise producers/consumers (removes the HBM round trip)."""
    return _bexpu_math(x, float(base_freq), float(noctaves + 1)).astype(x.dtype)


def bexpu(x: jnp.ndarray, *, base_freq: float, noctaves: int,
          tile_rows: int = 8192, donate_input: bool = False) -> jnp.ndarray:
    """Apply BExpU elementwise via Pallas. Output has the same shape/dtype as x."""
    f0 = float(base_freq)
    xmax = float(noctaves + 1)

    orig_shape = x.shape
    orig_dtype = x.dtype
    n = x.size
    if n == 0:
        return x

    flat = x.reshape(-1)
    n_main = n - (n % _LANES)

    if n_main == 0:
        # Sub-128-element input: a pallas_call is pure overhead.
        return bexpu_jnp(flat, base_freq=base_freq,
                         noctaves=noctaves).reshape(orig_shape)

    rows = n_main // _LANES
    x2 = flat[:n_main].reshape(rows, _LANES)

    # Block-row selection: keep >= ~4 grid steps whenever rows > 64 so the
    # auto-pipeline actually overlaps DMA with compute (and v7x can shard the
    # parallel axis across both TensorCores); cap at tile_rows (8192 rows ->
    # 4 MiB f32 block, 16 MiB double-buffered in+out).
    if rows <= 64:
        tr = rows                                   # single full-extent block
    else:
        quarter = pl.cdiv(rows, 4)
        quarter = max(8, (quarter // 8) * 8)        # multiple of 8 (sublanes)
        tr = min(tile_rows, quarter)
    grid = (pl.cdiv(rows, tr),)

    itemsize = jnp.dtype(orig_dtype).itemsize
    cost = pl.CostEstimate(flops=3 * n_main,
                           transcendentals=n_main,
                           bytes_accessed=2 * n_main * itemsize)

    kernel = functools.partial(_bexpu_kernel, f0=f0, xmax=xmax)

    out2 = pl.pallas_call(
        kernel,
        out_shape=jax.ShapeDtypeStruct((rows, _LANES), orig_dtype),
        grid_spec=pltpu.PrefetchScalarGridSpec(
            num_scalar_prefetch=0,
            grid=grid,
            in_specs=[pl.BlockSpec((tr, _LANES), lambda i: (i, 0))],
            out_specs=pl.BlockSpec((tr, _LANES), lambda i: (i, 0)),
        ),
        compiler_params=pltpu.CompilerParams(
            dimension_semantics=("parallel",),
            vmem_limit_bytes=48 * 1024 * 1024,
        ),
        cost_estimate=cost,
        input_output_aliases=({0: 0} if donate_input else {}),
    )(x2)

    out_flat = out2.reshape(-1)
    if n_main < n:
        # <128-element ragged tail: tiny fused jnp op instead of a full-tensor pad.
        tail = bexpu_jnp(flat[n_main:], base_freq=base_freq, noctaves=noctaves)
        out_flat = jnp.concatenate([out_flat, tail])
    return out_flat.reshape(orig_shape)


def bexpu_ref(x, *, base_freq, noctaves):
    xmax = float(noctaves + 1)
    xr = jnp.maximum(x - xmax, 0.0)
    xs = x - xr
    return base_freq * (jnp.exp2(xs) - 1.0)


if __name__ == "__main__":
    # cfg: base_freq=0.05, noctaves=5  ->  xmax = 6.0
    base_freq = 0.05
    noctaves = 5

    key = jax.random.PRNGKey(0)
    # small NCHW input consistent with an elementwise loss-activation module
    x = jax.random.uniform(key, (2, 4, 16, 16), dtype=jnp.float32,
                           minval=0.0, maxval=8.0)

    y = bexpu(x, base_freq=base_freq, noctaves=noctaves)
    y = jax.block_until_ready(y)

    y_ref = bexpu_ref(x, base_freq=base_freq, noctaves=noctaves)
    assert y.shape == x.shape and y.dtype == x.dtype
    assert jnp.allclose(y, y_ref, rtol=1e-6, atol=1e-6), "mismatch vs reference"

    # Also exercise a ragged (non-multiple-of-128) size to cover the tail path.
    x2 = jax.random.uniform(jax.random.PRNGKey(1), (3, 5, 7, 11),
                            dtype=jnp.float32, minval=0.0, maxval=8.0)
    y2 = jax.block_until_ready(bexpu(x2, base_freq=base_freq, noctaves=noctaves))
    y2_ref = bexpu_ref(x2, base_freq=base_freq, noctaves=noctaves)
    assert jnp.allclose(y2, y2_ref, rtol=1e-6, atol=1e-6), "ragged mismatch"

    print("KERNEL_OK")
</pallas_src>

<mosaic_0001>
module attributes {stable_mosaic.version = 11 : i64} {
  func.func @_bexpu_kernel(%arg0: i32, %arg1: memref<16x128xf32, #tpu.memory_space<vmem>>, %arg2: memref<16x128xf32, #tpu.memory_space<vmem>>) attributes {dimension_semantics = [#tpu.dimension_semantics<parallel>], iteration_bounds = array<i64: 1>, scalar_prefetch = 0 : i64, scratch_operands = 0 : i64, tpu.core_type = #tpu.core_type<tc>, window_params = [{transform_indices = @transform_0, window_bounds = array<i64: 16, 128>}, {transform_indices = @transform_1, window_bounds = array<i64: 16, 128>}]} {
    %c0 = arith.constant 0 : index
    %c0_0 = arith.constant 0 : index
    %0 = vector.load %arg1[%c0, %c0_0] : memref<16x128xf32, #tpu.memory_space<vmem>>, vector<16x128xf32>
    %cst = arith.constant 6.000000e+00 : f32
    %1 = vector.broadcast %cst : f32 to vector<16x128xf32>
    %2 = arith.minimumf %0, %1 : vector<16x128xf32>
    %3 = math.exp2 %2 : vector<16x128xf32>
    %cst_1 = arith.constant 1.000000e+00 : f32
    %4 = vector.broadcast %cst_1 : f32 to vector<16x128xf32>
    %5 = arith.subf %3, %4 : vector<16x128xf32>
    %cst_2 = arith.constant 5.000000e-02 : f32
    %6 = vector.broadcast %cst_2 : f32 to vector<16x128xf32>
    %7 = arith.mulf %6, %5 : vector<16x128xf32>
    %c0_3 = arith.constant 0 : index
    %c0_4 = arith.constant 0 : index
    %8 = vector.load %arg2[%c0_3, %c0_4] : memref<16x128xf32, #tpu.memory_space<vmem>>, vector<16x128xf32>
    tpu.vector_store %arg2[%c0_3, %c0_4], %7 {strides = array<i32>} : memref<16x128xf32, #tpu.memory_space<vmem>>, vector<16x128xf32>,
    return
  }
  func.func @transform_0(%arg0: i32) -> (i32, i32) {
    %c0_i32 = arith.constant 0 : i32
    %c0_i32_0 = arith.constant 0 : i32
    return %arg0, %c0_i32 : i32, i32
  }
  func.func @transform_1(%arg0: i32) -> (i32, i32) {
    %c0_i32 = arith.constant 0 : i32
    %c0_i32_0 = arith.constant 0 : i32
    return %arg0, %c0_i32 : i32, i32
  }
}

</mosaic_0001>

<bundles_post_ra>
// kernel: tpu_custom_call.1
= control target key start
LH: loop header
LB: loop body
LE: loop exit
PB: predicated region body
PF: predicated region fallthrough
CT: control target
= control target key end

     0   :  { %6 = vsyncpa [#allocation3], 0  ;;  %s154_s0 = inlined_call_operand.hbm [shape: f32[16,128], index: 0, kind: input, shape index: {}]   ;;  %s155_s1 = inlined_call_operand.hbm [shape: f32[16,128], index: 1, kind: output, shape index: {}]  }
   0x1   :  { %7 = vsyncpa [#allocation4], 0  ;;  %s110_s6 = smov [#allocation2]   ;;  %s62_s10 = scalar_lea.hbm %s154_s0, 256 }
   0x2   :  { %s13_s7 = sshll.u32 %s110_s6, 4  ;;  %p63_p0 = scmp.ne.s32.totalorder %s154_s0, %s62_s10  ;;  %s14_s7 = int_to_ptr.vmem [resolvable:$true] %s13_s7 }
   0x3   :  { %p66_p1 = scmp.lt.u32.totalorder %s62_s10, %s154_s0 }
   0x5   :  { %p68_p2 = pnand %p66_p1, %p63_p0 }
   0x7   :  { %71 = shalt.err (!%p68_p2)
}
   0x8   :  { %s72_s15 = scalar_lea.vmem %s14_s7, 256  ;;  %p77_p4 = scmp.lt.s32.totalorder %s14_s7, %s14_s7 }
   0x9   :  { %p73_p3 = scmp.ne.s32.totalorder %s14_s7, %s72_s15  ;;  %p78_p5 = scmp.lt.s32.totalorder %s72_s15, %s72_s15 }
   0xb   :  { %p79_p6 = por %p78_p5, %p77_p4 }
   0xd   :  { %p80_p7 = pnand %p79_p6, %p73_p3 }
   0xf   :  { %83 = shalt.err (!%p80_p7)
}
  0x10   :  { %s111_s16 = smov 128   ;;  %s112_s17 = smov 8  }
  0x11   :  { %19 = dma.hbm_to_vmem [thread:$0]  %s154_s0, 256, %s14_s7, [#allocation3], %s111_s16, %s111_s16, %s112_s17  }
  0x12   :  { %106 = dma.done.wait [#allocation3], 256  }
  0x13   :  { %107 = vsyncadd [#allocation3], 4294967040  ;;  %v23_v0 = vld [vmem:[#allocation2] sm:$0xff]  ;;  %v24_v1 = vld [vmem:[#allocation2 + $0x8] sm:$0xff]  ;;  %s113_s20 = smov [#allocation5]  }
  0x14   :  { %v25_v2 = vmin.f32 %v23_v0, 6.0  ;;  %v26_v3 = vmin.f32 %v24_v1, 6.0  ;;  %s40_s21 = sshll.u32 %s113_s20, 4  ;;  %s41_s21 = int_to_ptr.vmem [resolvable:$true] %s40_s21 }
  0x15   :  { %s84_s0 = scalar_lea.vmem %s41_s21, 256  ;;  %p89_p9 = scmp.lt.s32.totalorder %s41_s21, %s41_s21 }
  0x16   :  { %58 = vpow2.f32 %v25_v2  ;;  %p85_p8 = scmp.ne.s32.totalorder %s41_s21, %s84_s0  ;;  %p90_p10 = scmp.lt.s32.totalorder %s84_s0, %s84_s0 }
  0x17   :  { %60 = vpow2.f32 %v26_v3 }
  0x18   :  { %p91_p11 = por %p90_p10, %p89_p9 }
  0x1a   :  { %p92_p12 = pnand %p91_p11, %p85_p8 }
  0x20   :  { %v59_v4 = vpop.eup %58 }
  0x21   :  { %v61_v5 = vpop.eup %60  ;;  %v52_v6 = vadd.f32 -1.0, %v59_v4 }
  0x22   :  { %v53_v7 = vadd.f32 -1.0, %v61_v5 }
  0x23   :  { %v31_v8 = vmul.f32 0.05, %v52_v6 }
  0x24   :  { %v32_v9 = vmul.f32 0.05, %v53_v7 }
  0x25   :  { %33 = vst [vmem:[#allocation5] sm:$0xff] %v31_v8 }
  0x26   :  { %34 = vst [vmem:[#allocation5 + $0x8] sm:$0xff] %v32_v9 }
  0x27   :  { %95 = shalt.err (!%p92_p12)
}
  0x28   :  { %s96_s24 = scalar_lea.hbm %s155_s1, 256 }
  0x29   :  { %p97_p13 = scmp.ne.s32.totalorder %s155_s1, %s96_s24  ;;  %p100_p0 = scmp.lt.u32.totalorder %s96_s24, %s155_s1 }
  0x2b   :  { %p102_p1 = pnand %p100_p0, %p97_p13 }
  0x2d   :  { %105 = shalt.err (!%p102_p1)
}
  0x2e   :  { %46 = dma.vmem_to_hbm [thread:$0]  %s41_s21, 256, %s155_s1, [#allocation4], %s111_s16, %s111_s16, %s112_s17  }
  0x2f   :  { %108 = dma.done.wait [#allocation4], 256  }
  0x30   :  { %109 = vsyncadd [#allocation4], 4294967040 }
  0x31   :  { %50 = vsyncpa [#allocation3], 1 }
  0x32   :  { %51 = vsyncpa [#allocation4], 1 }

</bundles_post_ra>
